<compile_context>
chip_gen: v7x
topology: tpu7x:2x2x1
jax: 0.10.0
libtpu: 0.0.40
codegen_flags: <defaults>
</compile_context>

<pallas_src>
import jax
import jax.numpy as jnp
from jax.experimental import pallas as pl
from jax.experimental.pallas import tpu as pltpu

EMB_DIM = 1024      # BeheadedDenseNet121.output_embeddings_shape()
HID_DIM = 256       # head hidden dim
OUT_DIM = 256       # PretrainedHeadOnTLLV1DenseNet121.output_embeddings_shape()
LEAKY_SLOPE = 0.01  # torch.nn.LeakyReLU default
LN_EPS = 1e-5       # torch.nn.LayerNorm default

MIN_BATCH_TILE = 128   # fills MXU M dim on v5e; half of v6e/v7x MXU
MAX_BATCH_TILE = 256   # ~1.5 MiB VMEM total incl. double buffers -> fits all gens


def _cdiv(a, m):
    return (a + m - 1) // m


def _round_up(a, m):
    return _cdiv(a, m) * m


def _choose_batch_tile(b):
    """Large tile for MXU fill; >=2 grid steps when enough rows (v7x megacore)."""
    tile = min(MAX_BATCH_TILE, _round_up(b, 8))
    if b >= 2 * MIN_BATCH_TILE:
        tile = min(tile, max(MIN_BATCH_TILE, _round_up(_cdiv(b, 2), 8)))
    return tile


def _head_kernel(x_ref, w1_ref, b1_ref, w2_ref, b2_ref, o_ref):
    # x_ref:  (tile, EMB_DIM) bf16
    # w1_ref: (EMB_DIM, HID_DIM) bf16, b1_ref: (1, HID_DIM) f32
    # w2_ref: (HID_DIM, OUT_DIM) bf16, b2_ref: (1, OUT_DIM) f32
    # o_ref:  (tile, OUT_DIM) f32

    # Linear(1024 -> 256): bf16 MXU matmul, f32 accumulation.
    h = jnp.dot(x_ref[...], w1_ref[...], preferred_element_type=jnp.float32)
    h = h + b1_ref[...]

    # LeakyReLU(0.01) in f32 on the VPU.
    h = jnp.where(h > 0, h, LEAKY_SLOPE * h)

    # Linear(256 -> 256): cast activations to bf16 for the MXU, accumulate f32.
    y = jnp.dot(h.astype(jnp.bfloat16), w2_ref[...],
                preferred_element_type=jnp.float32)
    y = y + b2_ref[...]

    # LayerNorm(256, elementwise_affine=False): biased variance, eps=1e-5, f32.
    mean = jnp.mean(y, axis=-1, keepdims=True)
    centered = y - mean
    var = jnp.mean(centered * centered, axis=-1, keepdims=True)
    o_ref[...] = (centered * jax.lax.rsqrt(var + LN_EPS)).astype(o_ref.dtype)


@jax.jit
def head_forward(x, w1, b1, w2, b2):
    """x: (B, 1024) float32 embedding -> (B, 256) float32."""
    b = x.shape[0]
    tile = _choose_batch_tile(b)
    grid = (_cdiv(b, tile),)

    # bf16 matmul operands (f32 accumulation inside the kernel); biases stay f32.
    x_bf = x.astype(jnp.bfloat16)
    w1_bf = w1.astype(jnp.bfloat16)
    w2_bf = w2.astype(jnp.bfloat16)
    b1_2d = b1.reshape(1, HID_DIM).astype(jnp.float32)
    b2_2d = b2.reshape(1, OUT_DIM).astype(jnp.float32)

    # Weights / biases never change across the grid -> single-buffer them.
    resident = dict(pipeline_mode=pl.Buffered(1))

    out = pl.pallas_call(
        _head_kernel,
        out_shape=jax.ShapeDtypeStruct((b, OUT_DIM), jnp.float32),
        grid_spec=pltpu.PrefetchScalarGridSpec(
            num_scalar_prefetch=0,
            grid=grid,
            in_specs=[
                pl.BlockSpec((tile, EMB_DIM), lambda i: (i, 0)),
                pl.BlockSpec((EMB_DIM, HID_DIM), lambda i: (0, 0), **resident),
                pl.BlockSpec((1, HID_DIM), lambda i: (0, 0), **resident),
                pl.BlockSpec((HID_DIM, OUT_DIM), lambda i: (0, 0), **resident),
                pl.BlockSpec((1, OUT_DIM), lambda i: (0, 0), **resident),
            ],
            out_specs=pl.BlockSpec((tile, OUT_DIM), lambda i: (i, 0)),
        ),
        compiler_params=pltpu.CompilerParams(
            dimension_semantics=("parallel",),
        ),
    )(x_bf, w1_bf, b1_2d, w2_bf, b2_2d)
    return out


def init_params(key):
    """Deterministic synthetic weights, PyTorch-Linear-style uniform init."""
    k1, k2, k3, k4 = jax.random.split(key, 4)
    bound1 = 1.0 / (EMB_DIM ** 0.5)
    bound2 = 1.0 / (HID_DIM ** 0.5)
    w1 = jax.random.uniform(k1, (EMB_DIM, HID_DIM), jnp.float32, -bound1, bound1)
    b1 = jax.random.uniform(k2, (HID_DIM,), jnp.float32, -bound1, bound1)
    w2 = jax.random.uniform(k3, (HID_DIM, OUT_DIM), jnp.float32, -bound2, bound2)
    b2 = jax.random.uniform(k4, (OUT_DIM,), jnp.float32, -bound2, bound2)
    return w1, b1, w2, b2


def reference_forward(x, w1, b1, w2, b2):
    """Pure-JAX reference mirroring the kernel's bf16-matmul / f32-accum math."""
    h = jnp.dot(x.astype(jnp.bfloat16), w1.astype(jnp.bfloat16),
                preferred_element_type=jnp.float32) + b1
    h = jnp.where(h > 0, h, LEAKY_SLOPE * h)
    y = jnp.dot(h.astype(jnp.bfloat16), w2.astype(jnp.bfloat16),
                preferred_element_type=jnp.float32) + b2
    mean = jnp.mean(y, axis=-1, keepdims=True)
    var = jnp.mean((y - mean) ** 2, axis=-1, keepdims=True)
    return (y - mean) * jax.lax.rsqrt(var + LN_EPS)


if __name__ == "__main__":
    key = jax.random.PRNGKey(0)
    k_params, k_x = jax.random.split(key)
    w1, b1, w2, b2 = init_params(k_params)

    # Batch of 2 synthetic DenseNet121 embeddings (the PyTorch forward uses a
    # single image -> batch 1; batch 2 exercises the same row-wise semantics).
    x = jax.random.normal(k_x, (2, EMB_DIM), jnp.float32)

    out = jax.block_until_ready(head_forward(x, w1, b1, w2, b2))

    ref = reference_forward(x, w1, b1, w2, b2)
    assert out.shape == (2, OUT_DIM)
    assert out.dtype == jnp.float32
    max_err = float(jnp.max(jnp.abs(out - ref)))
    assert max_err < 2e-3, max_err
    print("KERNEL_OK")
</pallas_src>

<mosaic_0001>
module attributes {stable_mosaic.version = 11 : i64} {
  func.func @_head_kernel(%arg0: i32, %arg1: memref<8x1024xbf16, #tpu.memory_space<vmem>>, %arg2: memref<1024x256xbf16, #tpu.memory_space<vmem>>, %arg3: memref<1x256xf32, #tpu.memory_space<vmem>>, %arg4: memref<256x256xbf16, #tpu.memory_space<vmem>>, %arg5: memref<1x256xf32, #tpu.memory_space<vmem>>, %arg6: memref<8x256xf32, #tpu.memory_space<vmem>>) attributes {dimension_semantics = [#tpu.dimension_semantics<parallel>], iteration_bounds = array<i64: 1>, scalar_prefetch = 0 : i64, scratch_operands = 0 : i64, tpu.core_type = #tpu.core_type<tc>, window_params = [{transform_indices = @transform_0, window_bounds = array<i64: 8, 1024>}, {pipeline_mode = #tpu.pipeline_mode<synchronous>, transform_indices = @transform_1, window_bounds = array<i64: 1024, 256>}, {pipeline_mode = #tpu.pipeline_mode<synchronous>, transform_indices = @transform_2, window_bounds = array<i64: 1, 256>}, {pipeline_mode = #tpu.pipeline_mode<synchronous>, transform_indices = @transform_3, window_bounds = array<i64: 256, 256>}, {pipeline_mode = #tpu.pipeline_mode<synchronous>, transform_indices = @transform_4, window_bounds = array<i64: 1, 256>}, {transform_indices = @transform_5, window_bounds = array<i64: 8, 256>}]} {
    %c0 = arith.constant 0 : index
    %c0_0 = arith.constant 0 : index
    %0 = vector.load %arg1[%c0, %c0_0] : memref<8x1024xbf16, #tpu.memory_space<vmem>>, vector<8x1024xbf16>
    %c0_1 = arith.constant 0 : index
    %c0_2 = arith.constant 0 : index
    %1 = vector.load %arg2[%c0_1, %c0_2] : memref<1024x256xbf16, #tpu.memory_space<vmem>>, vector<1024x256xbf16>
    %cst = arith.constant dense<0.000000e+00> : vector<8x256xf32>
    %2 = tpu.matmul %0, %1, %cst {dimension_numbers = #tpu.dot_dimension_numbers<[1], [0], [0], [1], [0, 0, 1, 1], [], []>} : vector<8x1024xbf16>, vector<1024x256xbf16>, vector<8x256xf32> -> vector<8x256xf32>
    %c0_3 = arith.constant 0 : index
    %c0_4 = arith.constant 0 : index
    %3 = vector.load %arg3[%c0_3, %c0_4] : memref<1x256xf32, #tpu.memory_space<vmem>>, vector<1x256xf32>
    %4 = vector.broadcast %3 : vector<1x256xf32> to vector<8x256xf32>
    %5 = arith.addf %2, %4 : vector<8x256xf32>
    %cst_5 = arith.constant 0.000000e+00 : f32
    %6 = vector.broadcast %cst_5 : f32 to vector<8x256xf32>
    %7 = arith.cmpf ogt, %5, %6 : vector<8x256xf32>
    %cst_6 = arith.constant 0.00999999977 : f32
    %8 = vector.broadcast %cst_6 : f32 to vector<8x256xf32>
    %9 = arith.mulf %8, %5 : vector<8x256xf32>
    %10 = arith.select %7, %5, %9 : vector<8x256xi1>, vector<8x256xf32>
    %11 = arith.truncf %10 : vector<8x256xf32> to vector<8x256xbf16>
    %c0_7 = arith.constant 0 : index
    %c0_8 = arith.constant 0 : index
    %12 = vector.load %arg4[%c0_7, %c0_8] : memref<256x256xbf16, #tpu.memory_space<vmem>>, vector<256x256xbf16>
    %cst_9 = arith.constant dense<0.000000e+00> : vector<8x256xf32>
    %13 = tpu.matmul %11, %12, %cst_9 {dimension_numbers = #tpu.dot_dimension_numbers<[1], [0], [0], [1], [0, 0, 1, 1], [], []>} : vector<8x256xbf16>, vector<256x256xbf16>, vector<8x256xf32> -> vector<8x256xf32>
    %c0_10 = arith.constant 0 : index
    %c0_11 = arith.constant 0 : index
    %14 = vector.load %arg5[%c0_10, %c0_11] : memref<1x256xf32, #tpu.memory_space<vmem>>, vector<1x256xf32>
    %15 = vector.broadcast %14 : vector<1x256xf32> to vector<8x256xf32>
    %16 = arith.addf %13, %15 : vector<8x256xf32>
    %cst_12 = arith.constant dense<0.000000e+00> : vector<8xf32>
    %17 = vector.multi_reduction <add>, %16, %cst_12 [1] : vector<8x256xf32> to vector<8xf32>
    %18 = vector.shape_cast %17 : vector<8xf32> to vector<8x1xf32>
    %cst_13 = arith.constant 2.560000e+02 : f32
    %19 = vector.broadcast %cst_13 : f32 to vector<8x1xf32>
    %20 = arith.divf %18, %19 : vector<8x1xf32>
    %21 = vector.broadcast %20 : vector<8x1xf32> to vector<8x256xf32>
    %22 = arith.subf %16, %21 : vector<8x256xf32>
    %23 = arith.mulf %22, %22 : vector<8x256xf32>
    %cst_14 = arith.constant dense<0.000000e+00> : vector<8xf32>
    %24 = vector.multi_reduction <add>, %23, %cst_14 [1] : vector<8x256xf32> to vector<8xf32>
    %25 = vector.shape_cast %24 : vector<8xf32> to vector<8x1xf32>
    %cst_15 = arith.constant 2.560000e+02 : f32
    %26 = vector.broadcast %cst_15 : f32 to vector<8x1xf32>
    %27 = arith.divf %25, %26 : vector<8x1xf32>
    %cst_16 = arith.constant 9.99999974E-6 : f32
    %28 = vector.broadcast %cst_16 : f32 to vector<8x1xf32>
    %29 = arith.addf %27, %28 : vector<8x1xf32>
    %30 = math.rsqrt %29 : vector<8x1xf32>
    %31 = vector.broadcast %30 : vector<8x1xf32> to vector<8x256xf32>
    %32 = arith.mulf %22, %31 : vector<8x256xf32>
    %c0_17 = arith.constant 0 : index
    %c0_18 = arith.constant 0 : index
    %33 = vector.load %arg6[%c0_17, %c0_18] : memref<8x256xf32, #tpu.memory_space<vmem>>, vector<8x256xf32>
    tpu.vector_store %arg6[%c0_17, %c0_18], %32 {strides = array<i32>} : memref<8x256xf32, #tpu.memory_space<vmem>>, vector<8x256xf32>,
    return
  }
  func.func @transform_0(%arg0: i32) -> (i32, i32) {
    %c0_i32 = arith.constant 0 : i32
    %c0_i32_0 = arith.constant 0 : i32
    return %arg0, %c0_i32 : i32, i32
  }
  func.func @transform_1(%arg0: i32) -> (i32, i32) {
    %c0_i32 = arith.constant 0 : i32
    %c0_i32_0 = arith.constant 0 : i32
    %c0_i32_1 = arith.constant 0 : i32
    return %c0_i32, %c0_i32_0 : i32, i32
  }
  func.func @transform_2(%arg0: i32) -> (i32, i32) {
    %c0_i32 = arith.constant 0 : i32
    %c0_i32_0 = arith.constant 0 : i32
    %c0_i32_1 = arith.constant 0 : i32
    return %c0_i32, %c0_i32_0 : i32, i32
  }
  func.func @transform_3(%arg0: i32) -> (i32, i32) {
    %c0_i32 = arith.constant 0 : i32
    %c0_i32_0 = arith.constant 0 : i32
    %c0_i32_1 = arith.constant 0 : i32
    return %c0_i32, %c0_i32_0 : i32, i32
  }
  func.func @transform_4(%arg0: i32) -> (i32, i32) {
    %c0_i32 = arith.constant 0 : i32
    %c0_i32_0 = arith.constant 0 : i32
    %c0_i32_1 = arith.constant 0 : i32
    return %c0_i32, %c0_i32_0 : i32, i32
  }
  func.func @transform_5(%arg0: i32) -> (i32, i32) {
    %c0_i32 = arith.constant 0 : i32
    %c0_i32_0 = arith.constant 0 : i32
    return %arg0, %c0_i32 : i32, i32
  }
}

</mosaic_0001>

<bundles_post_ra>
// kernel: head_forward.1
= control target key start
LH: loop header
LB: loop body
LE: loop exit
PB: predicated region body
PF: predicated region fallthrough
CT: control target
= control target key end

     0   :  { %v155_v9 = vlaneseq  ;;  %v1812_v10 = vmov 1966171168   ;;  %s2402_s0 = inlined_call_operand.vmem [shape: bf16[2,1024], index: 0, kind: input, shape index: {}]   ;;  %s2403_s1 = inlined_call_operand.vmem [shape: bf16[1024,256], index: 1, kind: input, shape index: {}]   ;;  %s2404_s2 = inlined_call_operand.vmem [shape: f32[1,256], index: 2, kind: input, shape index: {}]   ;;  %s2405_s3 = inlined_call_operand.vmem [shape: bf16[256,256], index: 3, kind: input, shape index: {}]   ;;  %s2406_s4 = inlined_call_operand.vmem [shape: f32[1,256], index: 4, kind: input, shape index: {}]   ;;  %s2407_s5 = inlined_call_operand.hbm [shape: f32[2,256], index: 5, kind: output, shape index: {}]  }
   0x1   :  { %v1542_v0 = vld [vmem:[%s2403_s1 + $0x104] ss:$8 sps:$4 sm:$0xff]   ;;  %v1544_v1 = vld [vmem:[%s2403_s1 + $0x100] ss:$8 sps:$4 sm:$0xff]   ;;  %v1545_v2 = vld [vmem:[%s2403_s1 + $0x114] ss:$8 sps:$4 sm:$0xff]   ;;  %v174_v11 = vunpack.c.l.s4 %v1812_v10 }
   0x2   :  { %926 = vmatprep.subr.bf16.mxu0 %v1542_v0  ;;  %v1547_v3 = vld [vmem:[%s2403_s1 + $0x110] ss:$8 sps:$4 sm:$0xff]   ;;  %v1548_v4 = vld [vmem:[%s2403_s1 + $0x124] ss:$8 sps:$4 sm:$0xff]   ;;  %v1550_v5 = vld [vmem:[%s2403_s1 + $0x120] ss:$8 sps:$4 sm:$0xff]  }
   0x3   :  { %927 = vmatpush1.bf16.msra.mxu0 %v1544_v1  ;;  %v1551_v6 = vld [vmem:[%s2403_s1 + $0x134] ss:$8 sps:$4 sm:$0xff]   ;;  %v1553_v7 = vld [vmem:[%s2403_s1 + $0x130] ss:$8 sps:$4 sm:$0xff]   ;;  %v1554_v8 = vld [vmem:[%s2403_s1 + $0x144] ss:$8 sps:$4 sm:$0xff]   ;;  %v175_v15 = vunpack.c.0.s8 %v174_v11 }
   0x4   :  { %928 = vmatprep.subr.bf16.mxu0 %v1545_v2  ;;  %v1556_v12 = vld [vmem:[%s2403_s1 + $0x140] ss:$8 sps:$4 sm:$0xff]   ;;  %v1557_v13 = vld [vmem:[%s2403_s1 + $0x154] ss:$8 sps:$4 sm:$0xff]   ;;  %v1880_v14 = vshrl.u32 %v155_v9, 7 }
   0x5   :  { %v1559_v16 = vld [vmem:[%s2403_s1 + $0x150] ss:$8 sps:$4 sm:$0xff]   ;;  %v1560_v17 = vld [vmem:[%s2403_s1 + $0x164] ss:$8 sps:$4 sm:$0xff]   ;;  %v1562_v19 = vld [vmem:[%s2403_s1 + $0x160] ss:$8 sps:$4 sm:$0xff]  }
   0x6   :  { %v1889_v18 = vsub.s32 %v175_v15, %v1880_v14  ;;  %v21_v20 = vld [vmem:[%s2402_s0] sm:$0xff]  ;;  %v22_v21 = vld [vmem:[%s2402_s0 + $0x8] sm:$0xff]  ;;  %v23_v22 = vld [vmem:[%s2402_s0 + $0x10] sm:$0xff] }
   0x7   :  { %929 = vmatpush1.bf16.msra.mxu0 %v1547_v3  ;;  %v24_v23 = vld [vmem:[%s2402_s0 + $0x18] sm:$0xff]  ;;  %v1590_v24 = vld [vmem:[%s2402_s0] ss:$8 sps:$4 sm:$0xff]   ;;  %v170_v25 = vcombine.high %v21_v20, %v22_v21  ;;  %v1566_v36 = vld [vmem:[%s2403_s1 + $0x184] ss:$8 sps:$4 sm:$0xff]  }
   0x8   :  { %930 = vmatprep.subr.bf16.mxu0 %v1548_v4  ;;  %v1592_v26 = vld [vmem:[%s2402_s0 + $0x10] ss:$8 sps:$4 sm:$0xff]   ;;  %v172_v27 = vcombine.high %v23_v22, %v24_v23  ;;  %v1563_v28 = vld [vmem:[%s2403_s1 + $0x174] ss:$8 sps:$4 sm:$0xff]   ;;  %v179_v29 = vrot.slane %v1590_v24, %v1889_v18  ;;  %v1568_v39 = vld [vmem:[%s2403_s1 + $0x180] ss:$8 sps:$4 sm:$0xff]  }
   0x9   :  { %v1917_v30 = vrot.slane %v170_v25, %v1889_v18  ;;  %v193_v31 = vrot.slane %v1592_v26, %v1889_v18  ;;  %v1565_v33 = vld [vmem:[%s2403_s1 + $0x170] ss:$8 sps:$4 sm:$0xff]   ;;  %v1569_v41 = vld [vmem:[%s2403_s1 + $0x194] ss:$8 sps:$4 sm:$0xff]   ;;  %v1572_v43 = vld [vmem:[%s2403_s1 + $0x1a4] ss:$8 sps:$4 sm:$0xff]  }
   0xa   :  { %v1921_v32 = vrot.slane %v172_v27, %v1889_v18  ;;  %v1571_v42 = vld [vmem:[%s2403_s1 + $0x190] ss:$8 sps:$4 sm:$0xff]   ;;  %v1574_v44 = vld [vmem:[%s2403_s1 + $0x1a0] ss:$8 sps:$4 sm:$0xff]   ;;  %v1575_v45 = vld [vmem:[%s2403_s1 + $0x1b4] ss:$8 sps:$4 sm:$0xff]  }
   0xb   :  { %931 = vmatpush1.bf16.msra.mxu0 %v1550_v5  ;;  %v202_v34 = vcombine.high %v179_v29, %v193_v31  ;;  %v1577_v46 = vld [vmem:[%s2403_s1 + $0x1b0] ss:$8 sps:$4 sm:$0xff]   ;;  %v1578_v47 = vld [vmem:[%s2403_s1 + $0x1c4] ss:$8 sps:$4 sm:$0xff]  }
   0xc   :  { %932 = vmatprep.subr.bf16.mxu0 %v1551_v6  ;;  %v203_v35 = vcombine.low %v1917_v30, %v1921_v32 }
   0xd   :  { %v225_v37 = vrot.slane %v202_v34, %v1889_v18 }
   0xe   :  { %v1933_v38 = vrot.slane %v203_v35, %v1889_v18 }
   0xf   :  { %933 = vmatpush1.bf16.msra.mxu0 %v1553_v7  ;;  %v235_v40 = vcombine.high %v225_v37, %v225_v37  ;;  %917 = vmatprep.mubr.bf16.mxu1 %v225_v37 }
  0x10   :  { %934 = vmatprep.subr.bf16.mxu0 %v1554_v8 }
  0x11   :  { %958 = vmatprep.mubr.bf16.mxu0 %v235_v40 }
  0x13   :  { %935 = vmatpush1.bf16.msra.mxu0 %v1556_v12 }
  0x14   :  { %936 = vmatprep.subr.bf16.mxu0 %v1557_v13 }
  0x17   :  { %937 = vmatpush1.bf16.msra.mxu0 %v1559_v16 }
  0x18   :  { %938 = vmatprep.subr.bf16.mxu0 %v1560_v17 }
  0x1b   :  { %939 = vmatpush1.bf16.msra.mxu0 %v1562_v19 }
  0x1c   :  { %940 = vmatprep.subr.bf16.mxu0 %v1563_v28 }
  0x1f   :  { %941 = vmatpush1.bf16.msra.mxu0 %v1565_v33 }
  0x20   :  { %942 = vmatprep.subr.bf16.mxu0 %v1566_v36 }
  0x23   :  { %943 = vmatpush1.bf16.msra.mxu0 %v1568_v39 }
  0x24   :  { %944 = vmatprep.subr.bf16.mxu0 %v1569_v41 }
  0x27   :  { %945 = vmatpush1.bf16.msra.mxu0 %v1571_v42 }
  0x28   :  { %946 = vmatprep.subr.bf16.mxu0 %v1572_v43 }
  0x2b   :  { %947 = vmatpush1.bf16.msra.mxu0 %v1574_v44 }
  0x2c   :  { %10 = vsyncpa [#allocation3], 0  ;;  %948 = vmatprep.subr.bf16.mxu0 %v1575_v45  ;;  %v1639_v48 = vld [vmem:[%s2403_s1 + $0x4] ss:$8 sps:$4 sm:$0xff]   ;;  %v1641_v49 = vld [vmem:[%s2403_s1] ss:$8 sps:$4 sm:$0xff]   ;;  %v201_v59 = vcombine.low %v179_v29, %v193_v31  ;;  %v204_v2 = vcombine.high %v1917_v30, %v1921_v32 }
  0x2d   :  { %v1580_v50 = vld [vmem:[%s2403_s1 + $0x1c0] ss:$8 sps:$4 sm:$0xff]   ;;  %885 = vmatprep.subr.bf16.mxu1 %v1639_v48  ;;  %v1645_v51 = vld [vmem:[%s2403_s1 + $0x14] ss:$8 sps:$4 sm:$0xff]   ;;  %v1647_v52 = vld [vmem:[%s2403_s1 + $0x10] ss:$8 sps:$4 sm:$0xff]  }
  0x2e   :  { %886 = vmatpush1.bf16.msra.mxu1 %v1641_v49  ;;  %v1581_v53 = vld [vmem:[%s2403_s1 + $0x1d4] ss:$8 sps:$4 sm:$0xff]   ;;  %v1651_v54 = vld [vmem:[%s2403_s1 + $0x24] ss:$8 sps:$4 sm:$0xff]   ;;  %v1583_v55 = vld [vmem:[%s2403_s1 + $0x1d0] ss:$8 sps:$4 sm:$0xff]   ;;  %v2005_v0 = vrot.slane %v201_v59, %v1889_v18  ;;  %v2027_v8 = vrot.slane %v204_v2, %v1889_v18 }
  0x2f   :  { %949 = vmatpush1.bf16.msra.mxu0 %v1577_v46  ;;  %887 = vmatprep.subr.bf16.mxu1 %v1645_v51  ;;  %v1653_v56 = vld [vmem:[%s2403_s1 + $0x20] ss:$8 sps:$4 sm:$0xff]   ;;  %v1584_v57 = vld [vmem:[%s2403_s1 + $0x1e4] ss:$8 sps:$4 sm:$0xff]   ;;  %v1657_v58 = vld [vmem:[%s2403_s1 + $0x34] ss:$8 sps:$4 sm:$0xff]  }
  0x30   :  { %950 = vmatprep.subr.bf16.mxu0 %v1578_v47  ;;  %v1586_v60 = vld [vmem:[%s2403_s1 + $0x1e0] ss:$8 sps:$4 sm:$0xff]   ;;  %v1659_v61 = vld [vmem:[%s2403_s1 + $0x30] ss:$8 sps:$4 sm:$0xff]   ;;  %v1587_v62 = vld [vmem:[%s2403_s1 + $0x1f4] ss:$8 sps:$4 sm:$0xff]   ;;  %v233_v6 = vcombine.high %v2005_v0, %v2005_v0 }
  0x31   :  { %v1663_v63 = vld [vmem:[%s2403_s1 + $0x44] ss:$8 sps:$4 sm:$0xff]   ;;  %v1589_v1 = vld [vmem:[%s2403_s1 + $0x1f0] ss:$8 sps:$4 sm:$0xff]   ;;  %v1665_v3 = vld [vmem:[%s2403_s1 + $0x40] ss:$8 sps:$4 sm:$0xff]  }
  0x32   :  { %888 = vmatpush1.bf16.msra.mxu1 %v1647_v52  ;;  %v1596_v4 = vld [vmem:[%s2403_s1 + $0x204] ss:$8 sps:$4 sm:$0xff]   ;;  %v1669_v5 = vld [vmem:[%s2403_s1 + $0x54] ss:$8 sps:$4 sm:$0xff]   ;;  %v1594_v7 = vld [vmem:[%s2403_s1 + $0x200] ss:$8 sps:$4 sm:$0xff]  }
  0x33   :  { %951 = vmatpush1.bf16.msra.mxu0 %v1580_v50  ;;  %889 = vmatprep.subr.bf16.mxu1 %v1651_v54  ;;  %v1599_v9 = vld [vmem:[%s2403_s1 + $0x214] ss:$8 sps:$4 sm:$0xff]   ;;  %v1671_v10 = vld [vmem:[%s2403_s1 + $0x50] ss:$8 sps:$4 sm:$0xff]   ;;  %v1675_v11 = vld [vmem:[%s2403_s1 + $0x64] ss:$8 sps:$4 sm:$0xff]  }
  0x34   :  { %952 = vmatprep.subr.bf16.mxu0 %v1581_v53  ;;  %v1597_v12 = vld [vmem:[%s2403_s1 + $0x210] ss:$8 sps:$4 sm:$0xff]   ;;  %v1602_v13 = vld [vmem:[%s2403_s1 + $0x224] ss:$8 sps:$4 sm:$0xff]   ;;  %v1677_v15 = vld [vmem:[%s2403_s1 + $0x60] ss:$8 sps:$4 sm:$0xff]  }
  0x35   :  { %v1681_v16 = vld [vmem:[%s2403_s1 + $0x74] ss:$8 sps:$4 sm:$0xff]   ;;  %v1600_v17 = vld [vmem:[%s2403_s1 + $0x220] ss:$8 sps:$4 sm:$0xff]   ;;  %v1683_v19 = vld [vmem:[%s2403_s1 + $0x70] ss:$8 sps:$4 sm:$0xff]  }
  0x36   :  { %890 = vmatpush1.bf16.msra.mxu1 %v1653_v56  ;;  %v1605_v18 = vld [vmem:[%s2403_s1 + $0x234] ss:$8 sps:$4 sm:$0xff]   ;;  %v1687_v20 = vld [vmem:[%s2403_s1 + $0x84] ss:$8 sps:$4 sm:$0xff]   ;;  %v1603_v21 = vld [vmem:[%s2403_s1 + $0x230] ss:$8 sps:$4 sm:$0xff]  }
  0x37   :  { %953 = vmatpush1.bf16.msra.mxu0 %v1583_v55  ;;  %891 = vmatprep.subr.bf16.mxu1 %v1657_v58  ;;  %v1608_v22 = vld [vmem:[%s2403_s1 + $0x244] ss:$8 sps:$4 sm:$0xff]   ;;  %v1689_v23 = vld [vmem:[%s2403_s1 + $0x80] ss:$8 sps:$4 sm:$0xff]   ;;  %v1693_v24 = vld [vmem:[%s2403_s1 + $0x94] ss:$8 sps:$4 sm:$0xff]  }
  0x38   :  { %954 = vmatprep.subr.bf16.mxu0 %v1584_v57  ;;  %v1606_v25 = vld [vmem:[%s2403_s1 + $0x240] ss:$8 sps:$4 sm:$0xff]   ;;  %v1611_v26 = vld [vmem:[%s2403_s1 + $0x254] ss:$8 sps:$4 sm:$0xff]   ;;  %v1695_v27 = vld [vmem:[%s2403_s1 + $0x90] ss:$8 sps:$4 sm:$0xff]  }
  0x39   :  { %v1699_v28 = vld [vmem:[%s2403_s1 + $0xa4] ss:$8 sps:$4 sm:$0xff]   ;;  %v1609_v29 = vld [vmem:[%s2403_s1 + $0x250] ss:$8 sps:$4 sm:$0xff]   ;;  %v1701_v31 = vld [vmem:[%s2403_s1 + $0xa0] ss:$8 sps:$4 sm:$0xff]  }
  0x3a   :  { %892 = vmatpush1.bf16.msra.mxu1 %v1659_v61  ;;  %v1614_v30 = vld [vmem:[%s2403_s1 + $0x264] ss:$8 sps:$4 sm:$0xff]   ;;  %v1705_v32 = vld [vmem:[%s2403_s1 + $0xb4] ss:$8 sps:$4 sm:$0xff]   ;;  %v1612_v33 = vld [vmem:[%s2403_s1 + $0x260] ss:$8 sps:$4 sm:$0xff]  }
  0x3b   :  { %955 = vmatpush1.bf16.msra.mxu0 %v1586_v60  ;;  %893 = vmatprep.subr.bf16.mxu1 %v1663_v63  ;;  %v1617_v34 = vld [vmem:[%s2403_s1 + $0x274] ss:$8 sps:$4 sm:$0xff]   ;;  %v1707_v35 = vld [vmem:[%s2403_s1 + $0xb0] ss:$8 sps:$4 sm:$0xff]   ;;  %v1711_v36 = vld [vmem:[%s2403_s1 + $0xc4] ss:$8 sps:$4 sm:$0xff]  }
  0x3c   :  { %956 = vmatprep.subr.bf16.mxu0 %v1587_v62  ;;  %v1615_v37 = vld [vmem:[%s2403_s1 + $0x270] ss:$8 sps:$4 sm:$0xff]   ;;  %v1620_v39 = vld [vmem:[%s2403_s1 + $0x284] ss:$8 sps:$4 sm:$0xff]   ;;  %v1713_v40 = vld [vmem:[%s2403_s1 + $0xc0] ss:$8 sps:$4 sm:$0xff]  }
  0x3d   :  { %v1717_v41 = vld [vmem:[%s2403_s1 + $0xd4] ss:$8 sps:$4 sm:$0xff]   ;;  %v1618_v42 = vld [vmem:[%s2403_s1 + $0x280] ss:$8 sps:$4 sm:$0xff]   ;;  %v1719_v44 = vld [vmem:[%s2403_s1 + $0xd0] ss:$8 sps:$4 sm:$0xff]  }
  0x3e   :  { %894 = vmatpush1.bf16.msra.mxu1 %v1665_v3  ;;  %v1623_v43 = vld [vmem:[%s2403_s1 + $0x294] ss:$8 sps:$4 sm:$0xff]   ;;  %v1723_v45 = vld [vmem:[%s2403_s1 + $0xe4] ss:$8 sps:$4 sm:$0xff]   ;;  %v1621_v46 = vld [vmem:[%s2403_s1 + $0x290] ss:$8 sps:$4 sm:$0xff]  }
  0x3f   :  { %957 = vmatpush1.bf16.msra.mxu0 %v1589_v1  ;;  %895 = vmatprep.subr.bf16.mxu1 %v1669_v5  ;;  %v1626_v47 = vld [vmem:[%s2403_s1 + $0x2a4] ss:$8 sps:$4 sm:$0xff]   ;;  %v1725_v48 = vld [vmem:[%s2403_s1 + $0xe0] ss:$8 sps:$4 sm:$0xff]   ;;  %v1729_v49 = vld [vmem:[%s2403_s1 + $0xf4] ss:$8 sps:$4 sm:$0xff]  }
  0x40   :  { %967 = vmatprep.subr.bf16.mxu0 %v1596_v4  ;;  %v1624_v50 = vld [vmem:[%s2403_s1 + $0x2a0] ss:$8 sps:$4 sm:$0xff]   ;;  %v1629_v51 = vld [vmem:[%s2403_s1 + $0x2b4] ss:$8 sps:$4 sm:$0xff]   ;;  %v1731_v52 = vld [vmem:[%s2403_s1 + $0xf0] ss:$8 sps:$4 sm:$0xff]  }
  0x41   :  { %v1740_v53 = vld [vmem:[%s2405_s3 + $0x4] ss:$8 sps:$4 sm:$0xff]   ;;  %v1627_v54 = vld [vmem:[%s2403_s1 + $0x2b0] ss:$8 sps:$4 sm:$0xff]   ;;  %v1738_v56 = vld [vmem:[%s2405_s3] ss:$8 sps:$4 sm:$0xff]  }
  0x42   :  { %959 = vmatmul.mubr.bf16.vlgmr.msra.gmra.mrb[0].mxu0 %v233_v6  ;;  %896 = vmatpush1.bf16.msra.mxu1 %v1671_v10  ;;  %v1632_v55 = vld [vmem:[%s2403_s1 + $0x2c4] ss:$8 sps:$4 sm:$0xff]   ;;  %v1743_v57 = vld [vmem:[%s2405_s3 + $0x14] ss:$8 sps:$4 sm:$0xff]   ;;  %v1630_v58 = vld [vmem:[%s2403_s1 + $0x2c0] ss:$8 sps:$4 sm:$0xff]  }
  0x43   :  { %968 = vmatpush1.bf16.msra.mxu0 %v1594_v7  ;;  %999 = vmatprep.mubr.bf16.mxu0 %v2027_v8  ;;  %v1635_v59 = vld [vmem:[%s2403_s1 + $0x2d4] ss:$8 sps:$4 sm:$0xff]   ;;  %v1741_v60 = vld [vmem:[%s2405_s3 + $0x10] ss:$8 sps:$4 sm:$0xff]   ;;  %v1746_v61 = vld [vmem:[%s2405_s3 + $0x24] ss:$8 sps:$4 sm:$0xff]  }
  0x44   :  { %969 = vmatprep.subr.bf16.mxu0 %v1599_v9  ;;  %897 = vmatprep.subr.bf16.mxu1 %v1675_v11  ;;  %v1633_v62 = vld [vmem:[%s2403_s1 + $0x2d0] ss:$8 sps:$4 sm:$0xff]   ;;  %v1638_v63 = vld [vmem:[%s2403_s1 + $0x2e4] ss:$8 sps:$4 sm:$0xff]   ;;  %v1749_v1 = vld [vmem:[%s2405_s3 + $0x34] ss:$8 sps:$4 sm:$0xff]  }
  0x45   :  { %v1636_v2 = vld [vmem:[%s2403_s1 + $0x2e0] ss:$8 sps:$4 sm:$0xff]   ;;  %v1644_v3 = vld [vmem:[%s2403_s1 + $0x2f4] ss:$8 sps:$4 sm:$0xff]   ;;  %v1747_v4 = vld [vmem:[%s2405_s3 + $0x30] ss:$8 sps:$4 sm:$0xff]  }
  0x46   :  { %898 = vmatpush1.bf16.msra.mxu1 %v1677_v15  ;;  %v1752_v5 = vld [vmem:[%s2405_s3 + $0x44] ss:$8 sps:$4 sm:$0xff]   ;;  %v1642_v6 = vld [vmem:[%s2403_s1 + $0x2f0] ss:$8 sps:$4 sm:$0xff]   ;;  %v1750_v9 = vld [vmem:[%s2405_s3 + $0x40] ss:$8 sps:$4 sm:$0xff]  }
  0x47   :  { %970 = vmatpush1.bf16.msra.mxu0 %v1597_v12  ;;  %899 = vmatprep.subr.bf16.mxu1 %v1681_v16  ;;  %v1650_v7 = vld [vmem:[%s2403_s1 + $0x304] ss:$8 sps:$4 sm:$0xff]   ;;  %v1755_v10 = vld [vmem:[%s2405_s3 + $0x54] ss:$8 sps:$4 sm:$0xff]   ;;  %v1648_v11 = vld [vmem:[%s2403_s1 + $0x300] ss:$8 sps:$4 sm:$0xff]   ;;  %v236_v12 = vcombine.high %v2027_v8, %v2027_v8 }
  0x48   :  { %971 = vmatprep.subr.bf16.mxu0 %v1602_v13  ;;  %v1656_v13 = vld [vmem:[%s2403_s1 + $0x314] ss:$8 sps:$4 sm:$0xff]   ;;  %v1753_v15 = vld [vmem:[%s2405_s3 + $0x50] ss:$8 sps:$4 sm:$0xff]   ;;  %v1758_v16 = vld [vmem:[%s2405_s3 + $0x64] ss:$8 sps:$4 sm:$0xff]  }
  0x49   :  { %v1654_v8 = vld [vmem:[%s2403_s1 + $0x310] ss:$8 sps:$4 sm:$0xff]  }
  0x4a   :  { %900 = vmatpush1.bf16.msra.mxu1 %v1683_v19  ;;  %v1761_v19 = vld [vmem:[%s2405_s3 + $0x74] ss:$8 sps:$4 sm:$0xff]  }
  0x4b   :  { %972 = vmatpush1.bf16.msra.mxu0 %v1600_v17  ;;  %901 = vmatprep.subr.bf16.mxu1 %v1687_v20  ;;  %v1662_v17 = vld [vmem:[%s2403_s1 + $0x324] ss:$8 sps:$4 sm:$0xff]   ;;  %v1660_v20 = vld [vmem:[%s2403_s1 + $0x320] ss:$8 sps:$4 sm:$0xff]  }
  0x4c   :  { %973 = vmatprep.subr.bf16.mxu0 %v1605_v18  ;;  %v1756_v18 = vld [vmem:[%s2405_s3 + $0x60] ss:$8 sps:$4 sm:$0xff]  }
  0x4e   :  { %902 = vmatpush1.bf16.msra.mxu1 %v1689_v23  ;;  %v1764_v23 = vld [vmem:[%s2405_s3 + $0x84] ss:$8 sps:$4 sm:$0xff]  }
  0x4f   :  { %974 = vmatpush1.bf16.msra.mxu0 %v1603_v21  ;;  %903 = vmatprep.subr.bf16.mxu1 %v1693_v24  ;;  %v1668_v21 = vld [vmem:[%s2403_s1 + $0x334] ss:$8 sps:$4 sm:$0xff]   ;;  %v1666_v24 = vld [vmem:[%s2403_s1 + $0x330] ss:$8 sps:$4 sm:$0xff]  }
  0x50   :  { %975 = vmatprep.subr.bf16.mxu0 %v1608_v22  ;;  %v1759_v22 = vld [vmem:[%s2405_s3 + $0x70] ss:$8 sps:$4 sm:$0xff]  }
  0x52   :  { %904 = vmatpush1.bf16.msra.mxu1 %v1695_v27  ;;  %v1767_v27 = vld [vmem:[%s2405_s3 + $0x94] ss:$8 sps:$4 sm:$0xff]  }
  0x53   :  { %976 = vmatpush1.bf16.msra.mxu0 %v1606_v25  ;;  %905 = vmatprep.subr.bf16.mxu1 %v1699_v28  ;;  %v1674_v25 = vld [vmem:[%s2403_s1 + $0x344] ss:$8 sps:$4 sm:$0xff]   ;;  %v1672_v28 = vld [vmem:[%s2403_s1 + $0x340] ss:$8 sps:$4 sm:$0xff]  }
  0x54   :  { %977 = vmatprep.subr.bf16.mxu0 %v1611_v26  ;;  %v1762_v26 = vld [vmem:[%s2405_s3 + $0x80] ss:$8 sps:$4 sm:$0xff]  }
  0x56   :  { %906 = vmatpush1.bf16.msra.mxu1 %v1701_v31  ;;  %v1770_v31 = vld [vmem:[%s2405_s3 + $0xa4] ss:$8 sps:$4 sm:$0xff]  }
  0x57   :  { %978 = vmatpush1.bf16.msra.mxu0 %v1609_v29  ;;  %907 = vmatprep.subr.bf16.mxu1 %v1705_v32  ;;  %v1680_v29 = vld [vmem:[%s2403_s1 + $0x354] ss:$8 sps:$4 sm:$0xff]   ;;  %v1678_v32 = vld [vmem:[%s2403_s1 + $0x350] ss:$8 sps:$4 sm:$0xff]  }
  0x58   :  { %979 = vmatprep.subr.bf16.mxu0 %v1614_v30  ;;  %v1765_v30 = vld [vmem:[%s2405_s3 + $0x90] ss:$8 sps:$4 sm:$0xff]  }
  0x5a   :  { %908 = vmatpush1.bf16.msra.mxu1 %v1707_v35  ;;  %v1773_v35 = vld [vmem:[%s2405_s3 + $0xb4] ss:$8 sps:$4 sm:$0xff]  }
  0x5b   :  { %980 = vmatpush1.bf16.msra.mxu0 %v1612_v33  ;;  %909 = vmatprep.subr.bf16.mxu1 %v1711_v36  ;;  %v1686_v33 = vld [vmem:[%s2403_s1 + $0x364] ss:$8 sps:$4 sm:$0xff]   ;;  %v1684_v36 = vld [vmem:[%s2403_s1 + $0x360] ss:$8 sps:$4 sm:$0xff]  }
  0x5c   :  { %981 = vmatprep.subr.bf16.mxu0 %v1617_v34  ;;  %v1768_v34 = vld [vmem:[%s2405_s3 + $0xa0] ss:$8 sps:$4 sm:$0xff]  }
  0x5e   :  { %910 = vmatpush1.bf16.msra.mxu1 %v1713_v40  ;;  %v1776_v40 = vld [vmem:[%s2405_s3 + $0xc4] ss:$8 sps:$4 sm:$0xff]  }
  0x5f   :  { %982 = vmatpush1.bf16.msra.mxu0 %v1615_v37  ;;  %911 = vmatprep.subr.bf16.mxu1 %v1717_v41  ;;  %v1692_v37 = vld [vmem:[%s2403_s1 + $0x374] ss:$8 sps:$4 sm:$0xff]   ;;  %v1690_v41 = vld [vmem:[%s2403_s1 + $0x370] ss:$8 sps:$4 sm:$0xff]  }
  0x60   :  { %983 = vmatprep.subr.bf16.mxu0 %v1620_v39  ;;  %v1771_v39 = vld [vmem:[%s2405_s3 + $0xb0] ss:$8 sps:$4 sm:$0xff]  }
  0x62   :  { %912 = vmatpush1.bf16.msra.mxu1 %v1719_v44  ;;  %v1696_v44 = vld [vmem:[%s2403_s1 + $0x380] ss:$8 sps:$4 sm:$0xff]  }
  0x63   :  { %984 = vmatpush1.bf16.msra.mxu0 %v1618_v42  ;;  %913 = vmatprep.subr.bf16.mxu1 %v1723_v45  ;;  %v1698_v42 = vld [vmem:[%s2403_s1 + $0x384] ss:$8 sps:$4 sm:$0xff]   ;;  %v1704_v45 = vld [vmem:[%s2403_s1 + $0x394] ss:$8 sps:$4 sm:$0xff]  }
  0x64   :  { %985 = vmatprep.subr.bf16.mxu0 %v1623_v43  ;;  %v1774_v43 = vld [vmem:[%s2405_s3 + $0xc0] ss:$8 sps:$4 sm:$0xff]  }
  0x66   :  { %914 = vmatpush1.bf16.msra.mxu1 %v1725_v48  ;;  %v1708_v48 = vld [vmem:[%s2403_s1 + $0x3a0] ss:$8 sps:$4 sm:$0xff]  }
  0x67   :  { %986 = vmatpush1.bf16.msra.mxu0 %v1621_v46  ;;  %915 = vmatprep.subr.bf16.mxu1 %v1729_v49  ;;  %v1702_v46 = vld [vmem:[%s2403_s1 + $0x390] ss:$8 sps:$4 sm:$0xff]   ;;  %v1716_v49 = vld [vmem:[%s2403_s1 + $0x3b4] ss:$8 sps:$4 sm:$0xff]  }
  0x68   :  { %987 = vmatprep.subr.bf16.mxu0 %v1626_v47  ;;  %v1710_v47 = vld [vmem:[%s2403_s1 + $0x3a4] ss:$8 sps:$4 sm:$0xff]  }
  0x6a   :  { %916 = vmatpush1.bf16.msra.mxu1 %v1731_v52  ;;  %v1720_v52 = vld [vmem:[%s2403_s1 + $0x3c0] ss:$8 sps:$4 sm:$0xff]  }
  0x6b   :  { %988 = vmatpush1.bf16.msra.mxu0 %v1624_v50  ;;  %1261 = vmatprep.subr.bf16.mxu1 %v1740_v53  ;;  %v1714_v50 = vld [vmem:[%s2403_s1 + $0x3b0] ss:$8 sps:$4 sm:$0xff]   ;;  %v1728_v53 = vld [vmem:[%s2403_s1 + $0x3d4] ss:$8 sps:$4 sm:$0xff]  }
  0x6c   :  { %989 = vmatprep.subr.bf16.mxu0 %v1629_v51  ;;  %v1722_v51 = vld [vmem:[%s2403_s1 + $0x3c4] ss:$8 sps:$4 sm:$0xff]  }
  0x6d   :  { %918 = vmatmul.mubr.bf16.vlgmr.msra.gmra.mrb[0].mxu1 %v2005_v0  ;;  %v1744_v0 = vld [vmem:[%s2405_s3 + $0x20] ss:$8 sps:$4 sm:$0xff]  }
  0x6e   :  { %1262 = vmatpush1.bf16.msra.mxu1 %v1738_v56  ;;  %v1732_v56 = vld [vmem:[%s2403_s1 + $0x3e0] ss:$8 sps:$4 sm:$0xff]  }
  0x6f   :  { %990 = vmatpush1.bf16.msra.mxu0 %v1627_v54  ;;  %1263 = vmatprep.subr.bf16.mxu1 %v1743_v57  ;;  %v1726_v54 = vld [vmem:[%s2403_s1 + $0x3d0] ss:$8 sps:$4 sm:$0xff]   ;;  %v1737_v57 = vld [vmem:[%s2403_s1 + $0x3f4] ss:$8 sps:$4 sm:$0xff]  }
  0x70   :  { %991 = vmatprep.subr.bf16.mxu0 %v1632_v55  ;;  %v1734_v55 = vld [vmem:[%s2403_s1 + $0x3e4] ss:$8 sps:$4 sm:$0xff]  }
  0x72   :  { %1264 = vmatpush1.bf16.msra.mxu1 %v1741_v60  ;;  %v1777_v60 = vld [vmem:[%s2405_s3 + $0xd0] ss:$8 sps:$4 sm:$0xff]  }
  0x73   :  { %992 = vmatpush1.bf16.msra.mxu0 %v1630_v58  ;;  %1265 = vmatprep.subr.bf16.mxu1 %v1746_v61  ;;  %v1735_v58 = vld [vmem:[%s2403_s1 + $0x3f0] ss:$8 sps:$4 sm:$0xff]   ;;  %v1779_v61 = vld [vmem:[%s2405_s3 + $0xd4] ss:$8 sps:$4 sm:$0xff]  }
  0x74   :  { %993 = vmatprep.subr.bf16.mxu0 %v1635_v59  ;;  %v234_v59 = vcombine.high %v1933_v38, %v1933_v38 }
  0x76   :  { %1266 = vmatpush1.bf16.msra.mxu1 %v1744_v0  ;;  %v1783_v0 = vld [vmem:[%s2405_s3 + $0xf0] ss:$8 sps:$4 sm:$0xff]  }
  0x77   :  { %994 = vmatpush1.bf16.msra.mxu0 %v1633_v62  ;;  %1267 = vmatprep.subr.bf16.mxu1 %v1749_v1  ;;  %v1782_v62 = vld [vmem:[%s2405_s3 + $0xe4] ss:$8 sps:$4 sm:$0xff]  }
  0x78   :  { %995 = vmatprep.subr.bf16.mxu0 %v1638_v63  ;;  %v1785_v63 = vld [vmem:[%s2405_s3 + $0xf4] ss:$8 sps:$4 sm:$0xff]  }
  0x7a   :  { %1268 = vmatpush1.bf16.msra.mxu1 %v1747_v4 }
  0x7b   :  { %996 = vmatpush1.bf16.msra.mxu0 %v1636_v2  ;;  %1269 = vmatprep.subr.bf16.mxu1 %v1752_v5  ;;  %v157_v5 = vsub.s32 0, %v1880_v14 }
  0x7c   :  { %997 = vmatprep.subr.bf16.mxu0 %v1644_v3 }
  0x7e   :  { %1270 = vmatpush1.bf16.msra.mxu1 %v1750_v9 }
  0x7f   :  { %998 = vmatpush1.bf16.msra.mxu0 %v1642_v6  ;;  %1271 = vmatprep.subr.bf16.mxu1 %v1755_v10  ;;  %v153_v6 = vld [vmem:[%s2404_s2] sm:$0x3] }
  0x80   :  { %1008 = vmatprep.subr.bf16.mxu0 %v1650_v7  ;;  %v161_v7 = vsub.s32 1, %v1880_v14  ;;  %v158_v9 = vrot.slane %v153_v6, %v157_v5 }
  0x82   :  { %1000 = vmatmul.mubr.bf16.vlgmr.msra.gmra.mrb[0].mxu0 %v1933_v38  ;;  %1272 = vmatpush1.bf16.msra.mxu1 %v1753_v15  ;;  %v1780_v38 = vld [vmem:[%s2405_s3 + $0xe0] ss:$8 sps:$4 sm:$0xff]   ;;  %v162_v10 = vrot.slane %v153_v6, %v161_v7 }
  0x83   :  { %1009 = vmatpush1.bf16.msra.mxu0 %v1648_v11  ;;  %1040 = vmatprep.mubr.bf16.mxu0 %v236_v12 }
  0x84   :  { %1010 = vmatprep.subr.bf16.mxu0 %v1656_v13  ;;  %1273 = vmatprep.subr.bf16.mxu1 %v1758_v16 }
  0x86   :  { %1274 = vmatpush1.bf16.msra.mxu1 %v1756_v18 }
  0x87   :  { %1011 = vmatpush1.bf16.msra.mxu0 %v1654_v8  ;;  %1275 = vmatprep.subr.bf16.mxu1 %v1761_v19 }
  0x88   :  { %1012 = vmatprep.subr.bf16.mxu0 %v1662_v17 }
  0x8a   :  { %1276 = vmatpush1.bf16.msra.mxu1 %v1759_v22 }
  0x8b   :  { %1013 = vmatpush1.bf16.msra.mxu0 %v1660_v20  ;;  %1277 = vmatprep.subr.bf16.mxu1 %v1764_v23 }
  0x8c   :  { %1014 = vmatprep.subr.bf16.mxu0 %v1668_v21 }
  0x8e   :  { %1278 = vmatpush1.bf16.msra.mxu1 %v1762_v26 }
  0x8f   :  { %1015 = vmatpush1.bf16.msra.mxu0 %v1666_v24  ;;  %1279 = vmatprep.subr.bf16.mxu1 %v1767_v27 }
  0x90   :  { %1016 = vmatprep.subr.bf16.mxu0 %v1674_v25  ;;  %v1089_v25 = vld [vmem:[%s2406_s4] sm:$0x3] }
  0x91   :  { %v1094_v26 = vrot.slane %v1089_v25, %v157_v5  ;;  %v1098_v27 = vrot.slane %v1089_v25, %v161_v7 }
  0x92   :  { %1280 = vmatpush1.bf16.msra.mxu1 %v1765_v30 }
  0x93   :  { %1017 = vmatpush1.bf16.msra.mxu0 %v1672_v28  ;;  %1281 = vmatprep.subr.bf16.mxu1 %v1770_v31 }
  0x94   :  { %1018 = vmatprep.subr.bf16.mxu0 %v1680_v29 }
  0x96   :  { %1282 = vmatpush1.bf16.msra.mxu1 %v1768_v34 }
  0x97   :  { %1019 = vmatpush1.bf16.msra.mxu0 %v1678_v32  ;;  %1283 = vmatprep.subr.bf16.mxu1 %v1773_v35 }
  0x98   :  { %1020 = vmatprep.subr.bf16.mxu0 %v1686_v33 }
  0x9a   :  { %1284 = vmatpush1.bf16.msra.mxu1 %v1771_v39 }
  0x9b   :  { %1021 = vmatpush1.bf16.msra.mxu0 %v1684_v36  ;;  %1285 = vmatprep.subr.bf16.mxu1 %v1776_v40 }
  0x9c   :  { %1022 = vmatprep.subr.bf16.mxu0 %v1692_v37 }
  0x9e   :  { %1286 = vmatpush1.bf16.msra.mxu1 %v1774_v43 }
  0x9f   :  { %1023 = vmatpush1.bf16.msra.mxu0 %v1690_v41  ;;  %1287 = vmatprep.subr.bf16.mxu1 %v1779_v61 }
  0xa0   :  { %1024 = vmatprep.subr.bf16.mxu0 %v1698_v42 }
  0xa2   :  { %1288 = vmatpush1.bf16.msra.mxu1 %v1777_v60 }
  0xa3   :  { %1025 = vmatpush1.bf16.msra.mxu0 %v1696_v44  ;;  %1289 = vmatprep.subr.bf16.mxu1 %v1782_v62 }
  0xa4   :  { %1026 = vmatprep.subr.bf16.mxu0 %v1704_v45 }
  0xa6   :  { %1290 = vmatpush1.bf16.msra.mxu1 %v1780_v38 }
  0xa7   :  { %1027 = vmatpush1.bf16.msra.mxu0 %v1702_v46  ;;  %1291 = vmatprep.subr.bf16.mxu1 %v1785_v63  ;;  %v1813_v46 = vmov 1983009808  }
  0xa8   :  { %1028 = vmatprep.subr.bf16.mxu0 %v1710_v47  ;;  %v1324_v47 = vunpack.c.l.s4 %v1813_v46 }
  0xaa   :  { %1292 = vmatpush1.bf16.msra.mxu1 %v1783_v0 }
  0xab   :  { %1029 = vmatpush1.bf16.msra.mxu0 %v1708_v48  ;;  %v1325_v48 = vunpack.c.0.s8 %v1324_v47 }
  0xac   :  { %1030 = vmatprep.subr.bf16.mxu0 %v1716_v49 }
  0xaf   :  { %1031 = vmatpush1.bf16.msra.mxu0 %v1714_v50  ;;  %v1328_v50 = vsub.s32 %v1325_v48, %v1880_v14 }
  0xb0   :  { %1032 = vmatprep.subr.bf16.mxu0 %v1722_v51 }
  0xb3   :  { %1033 = vmatpush1.bf16.msra.mxu0 %v1720_v52 }
  0xb4   :  { %1034 = vmatprep.subr.bf16.mxu0 %v1728_v53 }
  0xb7   :  { %1035 = vmatpush1.bf16.msra.mxu0 %v1726_v54 }
  0xb8   :  { %1036 = vmatprep.subr.bf16.mxu0 %v1734_v55 }
  0xbb   :  { %1037 = vmatpush1.bf16.msra.mxu0 %v1732_v56 }
  0xbc   :  { %1038 = vmatprep.subr.bf16.mxu0 %v1737_v57 }
  0xbf   :  { %1039 = vmatpush1.bf16.msra.mxu0 %v1735_v58 }
  0xc2   :  { %1041 = vmatmul.mubr.bf16.vlgmr.msra.gmra.mrb[0].mxu0 %v234_v59 }
 0x140   :  { %v919_v1 = vpop.f32.mrb[0].mxu1 }
 0x141   :  { %v921_v2 = vpop.f32.mrb[1].mxu1  ;;  %v920_v11 = vadd.f32 %v919_v1, %v158_v9 }
 0x142   :  { %v923_v3 = vpop.f32.mrb[2].mxu1  ;;  %v922_v12 = vadd.f32 %v921_v2, %v162_v10 }
 0x143   :  { %v924_v4 = vpop.f32.mrb[3].mxu1 }
 0x195   :  { %v1042_v13 = vpop.f32.mrb[0].mxu0 }
 0x196   :  { %v1526_v15 = vadd.f32 %v1042_v13, %v920_v11  ;;  %v1044_v16 = vpop.f32.mrb[1].mxu0 }
 0x197   :  { %v1528_v8 = vadd.f32 %v1044_v16, %v922_v12  ;;  %v1046_v17 = vpop.f32.mrb[2].mxu0 }
 0x198   :  { %vm1049_vm0 = vcmp.gt.f32.partialorder %v1526_v15, 0.0  ;;  %v1051_v18 = vmul.f32 0.01, %v1526_v15  ;;  %v1047_v19 = vpop.f32.mrb[3].mxu0 }
 0x199   :  { %vm1050_vm1 = vcmp.gt.f32.partialorder %v1528_v8, 0.0  ;;  %v1052_v20 = vmul.f32 0.01, %v1528_v8 }
 0x19a   :  { %v1053_v21 = vsel %vm1049_vm0, %v1526_v15, %v1051_v18 }
 0x19b   :  { %v1054_v22 = vsel %vm1050_vm1, %v1528_v8, %v1052_v20  ;;  %v1055_v24 = vpack.c.bf16 %v1053_v21, %v1053_v21 }
 0x19c   :  { %v1056_v23 = vpack.c.bf16 %v1054_v22, %v1054_v22 }
 0x19e   :  { %1293 = vmatprep.mubr.bf16.mxu1 %v1056_v23 }
 0x19f   :  { %1294 = vmatmul.mubr.bf16.vlgmr.msra.gmra.mrb[4].mxu1 %v1055_v24 }
 0x272   :  { %v1295_v28 = vpop.f32.mrb[4].mxu1 }
 0x273   :  { %v1296_v29 = vadd.f32 %v1295_v28, %v1094_v26  ;;  %v1297_v30 = vpop.f32.mrb[5].mxu1 }
 0x274   :  { %v1298_v31 = vadd.f32 %v1297_v30, %v1098_v27  ;;  %v1299_v32 = vpop.f32.mrb[6].mxu1 }
 0x275   :  { %v1300_v33 = vpop.f32.mrb[7].mxu1 }
 0x276   :  { %v1302_v34 = vadd.f32 %v1298_v31, %v1296_v29 }
 0x278   :  { %1303 = vadd.xlane.f32.xlu0 %v1302_v34 }
 0x305   :  { %v1304_v35 = vpop.xlane.xlu0 %1303 }
 0x306   :  { %v1306_v36 = vmul.f32 0.00390625, %v1304_v35 }
 0x308   :  { %v1307_v37 = vsub.f32 %v1296_v29, %v1306_v36  ;;  %v1308_v39 = vsub.f32 %v1298_v31, %v1306_v36 }
 0x30a   :  { %v1309_v40 = vmul.f32 %v1307_v37, %v1307_v37  ;;  %v1310_v41 = vmul.f32 %v1308_v39, %v1308_v39 }
 0x30c   :  { %v1311_v42 = vadd.f32 %v1310_v41, %v1309_v40 }
 0x30e   :  { %1312 = vadd.xlane.f32.xlu0 %v1311_v42 }
 0x39b   :  { %v1313_v43 = vpop.xlane.xlu0 %1312 }
 0x39c   :  { %v1314_v44 = vmul.f32 0.00390625, %v1313_v43 }
 0x39e   :  { %v1315_v45 = vadd.f32 1e-05, %v1314_v44 }
 0x3a0   :  { %1786 = vrsqrt.f32 %v1315_v45 }
 0x3aa   :  { %v1787_v49 = vpop.eup %1786 }
 0x3ab   :  { %v1317_v51 = vmul.f32 %v1787_v49, %v1307_v37  ;;  %v1318_v52 = vmul.f32 %v1787_v49, %v1308_v39 }
 0x3ad   :  { %v1321_v53 = vcombine.low %v1317_v51, %v1318_v52  ;;  %v1322_v54 = vcombine.high %v1317_v51, %v1318_v52 }
 0x3af   :  { %v1329_v55 = vrot.slane %v1321_v53, %v1328_v50  ;;  %v1336_v56 = vrot.slane %v1322_v54, %v1328_v50  ;;  %1523 = vst.sshfl [vmem:[#allocation2] sm:$0x33 pattern:$0x76325410] %v1321_v53 }
 0x3b0   :  { %1524 = vst.sshfl [vmem:[#allocation2 + $0x8] sm:$0x33 pattern:$0x76325410] %v1322_v54 }
 0x3b1   :  { %v1337_v57 = vcombine.high %v1329_v55, %v1329_v55  ;;  %v1338_v58 = vcombine.high %v1336_v56, %v1336_v56 }
 0x3b3   :  { %1344 = vst [vmem:[#allocation2 + $0x4] sm:$0xf] %v1337_v57  ;;  %1346 = vst [vmem:[#allocation2 + $0xc] sm:$0xf] %v1338_v58 }
 0x3b4   :  { %1351 = vsyncadd [#allocation3], 192  ;;  %s1814_s4 = smov [#allocation2]  }
 0x3b5   :  { %s1352_s14 = sshll.u32 %s1814_s4, 4  ;;  %s1353_s14 = int_to_ptr.vmem [resolvable:$true] %s1352_s14 }
 0x3b6   :  { %s1788_s15 = scalar_lea.vmem %s1353_s14, 64  ;;  %s1792_s16 = scalar_lea.vmem %s1353_s14, 256 }
 0x3b7   :  { %p1789_p0 = scmp.ne.s32.totalorder %s1353_s14, %s1788_s15  ;;  %p1793_p1 = scmp.lt.s32.totalorder %s1353_s14, %s1353_s14 }
 0x3b8   :  { %p1794_p2 = scmp.lt.s32.totalorder %s1792_s16, %s1788_s15 }
 0x3ba   :  { %p1795_p3 = por %p1794_p2, %p1793_p1 }
 0x3bc   :  { %p1796_p4 = pnand %p1795_p3, %p1789_p0 }
 0x3be   :  { %1799 = shalt.err (!%p1796_p4)
}
 0x3bf   :  { %s1800_s19 = scalar_lea.hbm %s2407_s5, 64 }
 0x3c0   :  { %p1801_p5 = scmp.ne.s32.totalorder %s2407_s5, %s1800_s19  ;;  %p1804_p6 = scmp.lt.u32.totalorder %s1800_s19, %s2407_s5 }
 0x3c2   :  { %p1806_p7 = pnand %p1804_p6, %p1801_p5 }
 0x3c4   :  { %1809 = shalt.err (!%p1806_p7)
}
 0x3c5   :  { %s1815_s24 = smov 64   ;;  %s1816_s25 = smov 4  }
 0x3c6   :  { %1358 = dma.vmem_to_hbm [thread:$0]  %s1353_s14, 64, %s2407_s5, [#allocation3], %s1815_s24, %s1815_s24, %s1816_s25  }
 0x3c7   :  { %1810 = dma.done.wait [#allocation3], 256  }
 0x3c8   :  { %1811 = vsyncadd [#allocation3], 4294967040 }
 0x3c9   :  { %1362 = vsyncpa [#allocation3], 1 }

</bundles_post_ra>
